<compile_context>
chip_gen: v6e
topology: v6e:2x2x1
jax: 0.10.0
libtpu: 0.0.40
codegen_flags: <defaults>
</compile_context>

<pallas_src>
import jax
import jax.numpy as jnp
import numpy as np
from jax import lax
from jax.experimental import pallas as pl
from jax.experimental.pallas import tpu as pltpu


def _largest_divisor_leq(n, cap):
    for d in range(min(n, cap), 0, -1):
        if n % d == 0:
            return d
    return 1


def make_fact_encoder_kernel(NE, NP):
    def kernel(subj_ref, pred_ref, ent_ref, tbl_ref, o_ref):
        # subj_ref: (Bt, F, 1) int32  subject-entity index per fact (facts[:, :, 1])
        # pred_ref: (Bt, F, 1) int32  predicate id per fact        (facts[:, :, 2])
        # ent_ref:  (Bt, NE, D)       per-example encoded entities
        # tbl_ref:  (NP, D)           predicate embedding table (shared across batch)
        # o_ref:    (Bt, F, D)        encoded facts
        subj_idx = subj_ref[...]                                   # (Bt, F, 1)
        pred_idx = pred_ref[...]                                   # (Bt, F, 1)
        ent = ent_ref[...]                                         # (Bt, NE, D)
        tbl = tbl_ref[...]                                         # (NP, D)
        Bt, F, _ = subj_idx.shape
        D = ent.shape[-1]

        # Subject gather as one-hot (VPU) x entity table (MXU), batched per example.
        iota_ne = lax.broadcasted_iota(jnp.int32, (Bt, F, NE), 2)
        onehot_s = (subj_idx == iota_ne).astype(ent.dtype)         # (Bt, F, NE)
        subj = jnp.einsum("bfn,bnd->bfd", onehot_s, ent,
                          preferred_element_type=jnp.float32)      # (Bt, F, D) f32

        # Predicate embedding lookup as a single one-hot matmul against the shared table.
        iota_np = lax.broadcasted_iota(jnp.int32, (Bt, F, NP), 2)
        onehot_p = (pred_idx == iota_np).astype(tbl.dtype)         # (Bt, F, NP)
        pred = jnp.dot(onehot_p.reshape(Bt * F, NP), tbl,
                       preferred_element_type=jnp.float32)         # (Bt*F, D) f32
        pred = pred.reshape(Bt, F, D)

        o_ref[...] = (subj + pred).astype(o_ref.dtype)

    return kernel


def fact_encoder_forward(facts, entities_encoded, predicate_embedding_weight,
                         *, max_block_b=8):
    """facts:                      (B, F, 3) int   — [:, :, 1]=subject idx, [:, :, 2]=predicate id
       entities_encoded:           (B, NE, D)
       predicate_embedding_weight: (NP, D)         — nn.Embedding weight
       returns:                    (B, F, D)       — same as PyTorch FactEncoder.forward"""
    B, F, _ = facts.shape
    _, NE, D = entities_encoded.shape
    NP, Dw = predicate_embedding_weight.shape
    assert Dw == D

    # Tiny index columns; extracting them here costs ~B*F ints of HBM traffic.
    subj_idx = facts[:, :, 1].astype(jnp.int32)[..., None]   # (B, F, 1)
    pred_idx = facts[:, :, 2].astype(jnp.int32)[..., None]   # (B, F, 1)

    out_dtype = entities_encoded.dtype
    Bt = _largest_divisor_leq(B, max_block_b)                 # batch block per grid step
    grid = (B // Bt,)

    kernel = make_fact_encoder_kernel(NE, NP)

    return pl.pallas_call(
        kernel,
        out_shape=jax.ShapeDtypeStruct((B, F, D), out_dtype),
        grid_spec=pltpu.PrefetchScalarGridSpec(
            num_scalar_prefetch=0,
            grid=grid,
            in_specs=[
                pl.BlockSpec((Bt, F, 1), lambda i: (i, 0, 0)),
                pl.BlockSpec((Bt, F, 1), lambda i: (i, 0, 0)),
                pl.BlockSpec((Bt, NE, D), lambda i: (i, 0, 0)),
                pl.BlockSpec((NP, D), lambda i: (0, 0)),       # shared table, fetched once
            ],
            out_specs=pl.BlockSpec((Bt, F, D), lambda i: (i, 0, 0)),
        ),
        compiler_params=pltpu.CompilerParams(
            dimension_semantics=("parallel",)),                # shards across TCs on v7x
    )(subj_idx, pred_idx, entities_encoded, predicate_embedding_weight)


def fact_encoder_reference(facts, entities_encoded, predicate_embedding_weight):
    """Pure-JAX reference with exact PyTorch FactEncoder semantics."""
    subj_idx = facts[:, :, 1].astype(jnp.int32)               # (B, F)
    pred_idx = facts[:, :, 2].astype(jnp.int32)               # (B, F)
    subj = jax.vmap(lambda e, i: e[i])(entities_encoded, subj_idx)   # (B, F, D)
    pred = predicate_embedding_weight[pred_idx]                       # (B, F, D)
    return subj + pred


if __name__ == "__main__":
    # Small shapes consistent with the module:
    #   B examples, F facts per example, NE entities per example,
    #   NP predicates in the vocabulary, D = emb_dim (lane-dense).
    B, F = 2, 8
    NE, NP, D = 16, 8, 128

    key = jax.random.PRNGKey(0)
    k_id, k_s, k_p, k_e, k_w = jax.random.split(key, 5)

    fact_ids = jax.random.randint(k_id, (B, F, 1), 0, 1000, dtype=jnp.int32)
    subj_col = jax.random.randint(k_s, (B, F, 1), 0, NE, dtype=jnp.int32)
    pred_col = jax.random.randint(k_p, (B, F, 1), 0, NP, dtype=jnp.int32)
    facts = jnp.concatenate([fact_ids, subj_col, pred_col], axis=-1)   # (B, F, 3)

    entities_encoded = jax.random.normal(k_e, (B, NE, D), dtype=jnp.float32)
    predicate_embedding_weight = jax.random.normal(k_w, (NP, D), dtype=jnp.float32)

    out = fact_encoder_forward(facts, entities_encoded, predicate_embedding_weight)
    out = jax.block_until_ready(out)

    ref = fact_encoder_reference(facts, entities_encoded, predicate_embedding_weight)
    np.testing.assert_allclose(np.asarray(out), np.asarray(ref), rtol=1e-6, atol=1e-6)
    assert out.shape == (B, F, D)

    print("KERNEL_OK")
</pallas_src>

<mosaic_0001>
module attributes {stable_mosaic.version = 11 : i64} {
  func.func @kernel(%arg0: i32, %arg1: memref<2x8x1xi32, #tpu.memory_space<vmem>>, %arg2: memref<2x8x1xi32, #tpu.memory_space<vmem>>, %arg3: memref<2x16x128xf32, #tpu.memory_space<vmem>>, %arg4: memref<8x128xf32, #tpu.memory_space<vmem>>, %arg5: memref<2x8x128xf32, #tpu.memory_space<vmem>>) attributes {dimension_semantics = [#tpu.dimension_semantics<parallel>], iteration_bounds = array<i64: 1>, scalar_prefetch = 0 : i64, scratch_operands = 0 : i64, tpu.core_type = #tpu.core_type<tc>, window_params = [{transform_indices = @transform_0, window_bounds = array<i64: 2, 8, 1>}, {transform_indices = @transform_1, window_bounds = array<i64: 2, 8, 1>}, {transform_indices = @transform_2, window_bounds = array<i64: 2, 16, 128>}, {pipeline_mode = #tpu.pipeline_mode<synchronous>, transform_indices = @transform_3, window_bounds = array<i64: 8, 128>}, {transform_indices = @transform_4, window_bounds = array<i64: 2, 8, 128>}]} {
    %c0 = arith.constant 0 : index
    %c0_0 = arith.constant 0 : index
    %c0_1 = arith.constant 0 : index
    %0 = vector.load %arg1[%c0, %c0_0, %c0_1] : memref<2x8x1xi32, #tpu.memory_space<vmem>>, vector<2x8x1xi32>
    %c0_2 = arith.constant 0 : index
    %c0_3 = arith.constant 0 : index
    %c0_4 = arith.constant 0 : index
    %1 = vector.load %arg2[%c0_2, %c0_3, %c0_4] : memref<2x8x1xi32, #tpu.memory_space<vmem>>, vector<2x8x1xi32>
    %c0_5 = arith.constant 0 : index
    %c0_6 = arith.constant 0 : index
    %c0_7 = arith.constant 0 : index
    %2 = vector.load %arg3[%c0_5, %c0_6, %c0_7] : memref<2x16x128xf32, #tpu.memory_space<vmem>>, vector<2x16x128xf32>
    %c0_8 = arith.constant 0 : index
    %c0_9 = arith.constant 0 : index
    %3 = vector.load %arg4[%c0_8, %c0_9] : memref<8x128xf32, #tpu.memory_space<vmem>>, vector<8x128xf32>
    %4 = tpu.iota {dimensions = array<i32: 2>} : vector<2x8x16xi32>
    %5 = vector.broadcast %0 : vector<2x8x1xi32> to vector<2x8x16xi32>
    %6 = arith.cmpi eq, %5, %4 : vector<2x8x16xi32>
    %7 = arith.extui %6 : vector<2x8x16xi1> to vector<2x8x16xi32>
    %8 = arith.sitofp %7 : vector<2x8x16xi32> to vector<2x8x16xf32>
    "tpu.trace_start"() <{level = 10 : i32, message = "bfn,bnd->bfd"}> : () -> ()
    %cst = arith.constant dense<0.000000e+00> : vector<2x8x128xf32>
    %9 = tpu.matmul %8, %2, %cst {dimension_numbers = #tpu.dot_dimension_numbers<[2], [1], [1], [2], [0, 0, 0, 1, 1, 2], [0], [0]>} : vector<2x8x16xf32>, vector<2x16x128xf32>, vector<2x8x128xf32> -> vector<2x8x128xf32>
    "tpu.trace_stop"() : () -> ()
    %10 = tpu.iota {dimensions = array<i32: 2>} : vector<2x8x8xi32>
    %11 = vector.broadcast %1 : vector<2x8x1xi32> to vector<2x8x8xi32>
    %12 = arith.cmpi eq, %11, %10 : vector<2x8x8xi32>
    %13 = arith.extui %12 : vector<2x8x8xi1> to vector<2x8x8xi32>
    %14 = arith.sitofp %13 : vector<2x8x8xi32> to vector<2x8x8xf32>
    %15 = vector.shape_cast %14 : vector<2x8x8xf32> to vector<16x8xf32>
    %cst_10 = arith.constant dense<0.000000e+00> : vector<16x128xf32>
    %16 = tpu.matmul %15, %3, %cst_10 {dimension_numbers = #tpu.dot_dimension_numbers<[1], [0], [0], [1], [0, 0, 1, 1], [], []>} : vector<16x8xf32>, vector<8x128xf32>, vector<16x128xf32> -> vector<16x128xf32>
    %17 = vector.shape_cast %16 : vector<16x128xf32> to vector<2x8x128xf32>
    %18 = arith.addf %9, %17 : vector<2x8x128xf32>
    %c0_11 = arith.constant 0 : index
    %c0_12 = arith.constant 0 : index
    %c0_13 = arith.constant 0 : index
    %19 = vector.load %arg5[%c0_11, %c0_12, %c0_13] : memref<2x8x128xf32, #tpu.memory_space<vmem>>, vector<2x8x128xf32>
    tpu.vector_store %arg5[%c0_11, %c0_12, %c0_13], %18 {strides = array<i32>} : memref<2x8x128xf32, #tpu.memory_space<vmem>>, vector<2x8x128xf32>,
    return
  }
  func.func @transform_0(%arg0: i32) -> (i32, i32, i32) {
    %c0_i32 = arith.constant 0 : i32
    %c0_i32_0 = arith.constant 0 : i32
    %c0_i32_1 = arith.constant 0 : i32
    return %arg0, %c0_i32, %c0_i32_0 : i32, i32, i32
  }
  func.func @transform_1(%arg0: i32) -> (i32, i32, i32) {
    %c0_i32 = arith.constant 0 : i32
    %c0_i32_0 = arith.constant 0 : i32
    %c0_i32_1 = arith.constant 0 : i32
    return %arg0, %c0_i32, %c0_i32_0 : i32, i32, i32
  }
  func.func @transform_2(%arg0: i32) -> (i32, i32, i32) {
    %c0_i32 = arith.constant 0 : i32
    %c0_i32_0 = arith.constant 0 : i32
    %c0_i32_1 = arith.constant 0 : i32
    return %arg0, %c0_i32, %c0_i32_0 : i32, i32, i32
  }
  func.func @transform_3(%arg0: i32) -> (i32, i32) {
    %c0_i32 = arith.constant 0 : i32
    %c0_i32_0 = arith.constant 0 : i32
    %c0_i32_1 = arith.constant 0 : i32
    return %c0_i32, %c0_i32_0 : i32, i32
  }
  func.func @transform_4(%arg0: i32) -> (i32, i32, i32) {
    %c0_i32 = arith.constant 0 : i32
    %c0_i32_0 = arith.constant 0 : i32
    %c0_i32_1 = arith.constant 0 : i32
    return %arg0, %c0_i32, %c0_i32_0 : i32, i32, i32
  }
}

</mosaic_0001>

<bundles_post_ra>
// kernel: tpu_custom_call.1
= control target key start
LH: loop header
LB: loop body
LE: loop exit
PB: predicated region body
PF: predicated region fallthrough
CT: control target
= control target key end

     0   :  { %v366_v2 = vmov 0   ;;  %s431_s0 = inlined_call_operand.vmem [shape: s32[2,8,1], index: 0, kind: input, shape index: {}]   ;;  %s432_s1 = inlined_call_operand.vmem [shape: s32[2,8,1], index: 1, kind: input, shape index: {}]   ;;  %s433_s2 = inlined_call_operand.vmem [shape: f32[2,16,128], index: 2, kind: input, shape index: {}]   ;;  %s434_s3 = inlined_call_operand.vmem [shape: f32[8,128], index: 3, kind: input, shape index: {}]   ;;  %s435_s4 = inlined_call_operand.hbm [shape: f32[2,8,128], index: 4, kind: output, shape index: {}]  }
   0x1   :  { %v20_v0 = vld [vmem:[%s432_s1] sm:$0xff]  ;;  %343 = vset.pattern.permute.xlu1 %v366_v2  ;;  %342 = vset.pattern.permute.xlu0 %v366_v2  ;;  %v23_v3 = vld [vmem:[%s433_s2 + $0x8] sm:$0xff] }
   0x2   :  { %v18_v1 = vld [vmem:[%s431_s0] sm:$0xff]  ;;  %42 = vperm.xlu0 %342, %v20_v0  }
   0x3   :  { %v26_v4 = vld [vmem:[%s434_s3] sm:$0xff]  ;;  %30 = vperm.xlu1 %343, %v18_v1  }
   0x4   :  { %9 = vsyncpa [#allocation3], 0  ;;  %v21_v5 = vld [vmem:[%s432_s1 + $0x8] sm:$0xff]  ;;  %v367_v7 = vmov 0.0   ;;  %317 = vmatprep.subr.mxu0 %v26_v4  ;;  %v22_v8 = vld [vmem:[%s433_s2] sm:$0xff]  ;;  %vm368_vm0 = vmmov 0   ;;  %v27_v9 = vlaneseq }
   0x5   :  { %v19_v6 = vld [vmem:[%s431_s0 + $0x8] sm:$0xff]  ;;  %322 = vmatprep.subr.mxu1 %v367_v7  ;;  %326 = vmatprep.mubr.msk.f32.mxu1 %vm368_vm0, %v367_v7  ;;  %vm53_vm1 = vcmask 64512   ;;  %vm135_vm2 = vcmask 130048   ;;  %v25_v17 = vld [vmem:[%s433_s2 + $0x18] sm:$0xff]  ;;  %v24_v19 = vld [vmem:[%s433_s2 + $0x10] sm:$0xff]  ;;  %s369_s30 = smov [#allocation2]  }
   0x6   :  { %323 = vmatpush3.msra.mxu1 %v23_v3  ;;  %318 = vmatpush3.msra.mxu0 %v26_v4  ;;  %v28_v10 = vand.u32 127, %v27_v9  ;;  %s289_s5 = sshll.u32 %s369_s30, 4  ;;  %s290_s5 = int_to_ptr.vmem [resolvable:$true] %s289_s5 }
   0x7   :  { %324 = vmatprep.subr.mxu1 %v367_v7  ;;  %45 = vperm.xlu0 %342, %v21_v5   ;;  %s344_s2 = scalar_lea.vmem %s290_s5, 256  ;;  %p349_p1 = scmp.lt.s32.totalorder %s290_s5, %s290_s5 }
   0x8   :  { %33 = vperm.xlu1 %343, %v19_v6   ;;  %325 = vmatpush3.msra.mxu1 %v22_v8  ;;  %p345_p0 = scmp.ne.s32.totalorder %s290_s5, %s344_s2  ;;  %p350_p2 = scmp.lt.s32.totalorder %s344_s2, %s344_s2 }
   0x9   :  { %329 = vmatprep.subr.mxu0 %v367_v7 }
   0xa   :  { %p351_p3 = por %p350_p2, %p349_p1 }
   0xc   :  { %p352_p4 = pnand %p351_p3, %p345_p0 }
  0x7d   :  { %v43_v11 = vpop.permute.xlu0 %42 }
  0x7e   :  { %v31_v12 = vpop.permute.xlu1 %30  ;;  %vm47_vm3 = vcmp.eq.s32.totalorder %v43_v11, %v28_v10 }
  0x7f   :  { %vm35_vm4 = vcmp.eq.s32.totalorder %v31_v12, %v28_v10  ;;  %v302_v14 = vsel %vm47_vm3, 1.0, %v367_v7 }
  0x80   :  { %v300_v13 = vsel %vm35_vm4, 1.0, %v367_v7  ;;  %319 = vmatprep.mubr.msk.f32.mxu0 %vm53_vm1, %v302_v14 }
  0x81   :  { %327 = vmatmul.mubr.msk.f32.vlgmr.msra.gmra.mxu1 %vm135_vm2, %v300_v13 }
  0x82   :  { %v46_v15 = vpop.permute.xlu0 %45 }
  0x83   :  { %v34_v16 = vpop.permute.xlu1 %33  ;;  %vm48_vm5 = vcmp.eq.s32.totalorder %v46_v15, %v28_v10 }
  0x84   :  { %v303_v18 = vsel %vm48_vm5, 1.0, %v367_v7  ;;  %vm36_vm6 = vcmp.eq.s32.totalorder %v34_v16, %v28_v10 }
  0x85   :  { %320 = vmatmul.mubr.msk.f32.vlgmr.msra.gmra.mxu0 %vm53_vm1, %v303_v18  ;;  %v301_v20 = vsel %vm36_vm6, 1.0, %v367_v7 }
  0x86   :  { %330 = vmatpush3.msra.mxu0 %v25_v17  ;;  %333 = vmatprep.mubr.msk.f32.mxu0 %vm368_vm0, %v367_v7 }
  0x87   :  { %331 = vmatprep.subr.mxu0 %v367_v7 }
  0x88   :  { %332 = vmatpush3.msra.mxu0 %v24_v19 }
  0x89   :  { %334 = vmatmul.mubr.msk.f32.vlgmr.msra.gmra.mxu0 %vm135_vm2, %v301_v20 }
 0x141   :  { %v205_v21 = vpop.f32.mrf.mxu1 }
 0x143   :  { %v328_v22 = vpop.f32.mrf.mxu1 }
 0x145   :  { %v321_v23 = vpop.f32.mrf.mxu0 }
 0x147   :  { %v126_v24 = vpop.f32.mrf.mxu0 }
 0x148   :  { %v206_v25 = vadd.f32 %v205_v21, %v126_v24 }
 0x149   :  { %v278_v26 = vpop.f32.mrf.mxu0 }
 0x14a   :  { %282 = vst [vmem:[#allocation2] sm:$0xff] %v206_v25  ;;  %v279_v27 = vadd.f32 %v321_v23, %v278_v26 }
 0x14b   :  { %v335_v28 = vpop.f32.mrf.mxu0 }
 0x14c   :  { %283 = vst [vmem:[#allocation2 + $0x8] sm:$0xff] %v279_v27 }
 0x14d   :  { %355 = shalt.err (!%p352_p4)
}
 0x14e   :  { %s370_s6 = smov 128   ;;  %s371_s7 = smov 8  }
 0x14f   :  { %295 = dma.vmem_to_hbm [thread:$0]  %s290_s5, 256, %s435_s4, [#allocation3], %s370_s6, %s370_s6, %s371_s7  }
 0x150   :  { %364 = dma.done.wait [#allocation3], 256  }
 0x151   :  { %365 = vsyncadd [#allocation3], 4294967040 }
 0x152   :  { %299 = vsyncpa [#allocation3], 1 }

</bundles_post_ra>
